<compile_context>
chip_gen: v7x
topology: tpu7x:2x2x1
jax: 0.10.0
libtpu: 0.0.40
codegen_flags: <defaults>
</compile_context>

<pallas_src>
import jax
import jax.numpy as jnp
from jax.experimental import pallas as pl
from jax.experimental.pallas import tpu as pltpu


# ----------------------------------------------------------------------------
# Kernels
# ----------------------------------------------------------------------------

def _attention_kernel_vpu(x_ref, w1_ref, b1_ref, w2_ref, b2_ref, o_ref):
    """Small-C path.

    x_ref / o_ref : (C, R, 128) VMEM block (pixels dense on sublanes + lanes).
    w1_ref (Ch, C), b1_ref (Ch,), w2_ref (C, Ch), b2_ref (C,): f32 in SMEM.
    The two 1x1 convs are unrolled per-channel broadcast-FMAs on the VPU
    (a K=C<8 matmul would waste the MXU); accumulation is f32.
    """
    C, R, L = x_ref.shape
    Ch = w1_ref.shape[0]

    x = x_ref[...]
    xf = x.astype(jnp.float32)

    # conv1 (1x1) + ReLU:  h[d] = max(0, b1[d] + sum_c w1[d, c] * x[c])
    h = []
    for d in range(Ch):
        acc = jnp.zeros((R, L), jnp.float32) + b1_ref[d]
        for c in range(C):
            acc = acc + w1_ref[d, c] * xf[c]
        h.append(jnp.maximum(acc, 0.0))

    # conv2 (1x1) + Sigmoid + gate, one output-channel slab at a time.
    for c in range(C):
        a = jnp.zeros((R, L), jnp.float32) + b2_ref[c]
        for d in range(Ch):
            a = a + w2_ref[c, d] * h[d]
        a = jax.nn.sigmoid(a)
        o_ref[c] = (x[c] * a.astype(x.dtype)).astype(o_ref.dtype)


def _attention_kernel_mxu(x_ref, w1_ref, b1_ref, w2_ref, b2_ref, o_ref):
    """Large-C path.

    x_ref / o_ref : (C, T) VMEM block (channels on sublanes, pixels on lanes).
    w1_ref (Ch, C), b1_ref (Ch, 1), w2_ref (C, Ch), b2_ref (C, 1): f32 VMEM.
    x is fed to the MXU in its native dtype (no full-tile f32 upcast);
    accumulation happens in f32 via preferred_element_type.
    """
    x = x_ref[...]
    w1 = w1_ref[...]
    # First 1x1 conv: (Ch, C) @ (C, T) -> (Ch, T), f32 accumulate.
    h = jnp.dot(w1.astype(x.dtype), x, preferred_element_type=jnp.float32)
    h = jnp.maximum(h + b1_ref[...], 0.0)
    # Second 1x1 conv in f32 (h is f32 and Ch = C//4 is small).
    a = jnp.dot(w2_ref[...], h, preferred_element_type=jnp.float32) + b2_ref[...]
    a = jax.nn.sigmoid(a)
    o_ref[...] = (x * a.astype(x.dtype)).astype(o_ref.dtype)


# ----------------------------------------------------------------------------
# Tile pickers (byte-budgeted, grid-step aware)
# ----------------------------------------------------------------------------

_MIN_GRID_STEPS = 4  # enough steps for double-buffering / both v7x TCs


def _pick_tile_lanes(hw_padded, n, c, itemsize, target_bytes):
    """Largest multiple-of-128 divisor of hw_padded within the byte budget,
    preferring one that still leaves >= _MIN_GRID_STEPS grid steps."""
    max_lanes = max(128, (target_bytes // max(1, c * itemsize)) // 128 * 128)
    cands = []
    t = (min(max_lanes, hw_padded) // 128) * 128
    while t >= 128:
        if hw_padded % t == 0:
            cands.append(t)
        t -= 128
    for t in cands:  # descending
        if n * (hw_padded // t) >= _MIN_GRID_STEPS:
            return t
    return cands[0]


def _pick_tile_rows(p, n, c, itemsize, target_bytes):
    """Row tile R for the (C, P, 128) layout: R must divide P and be a
    multiple of 8 (or equal P).  Returns None if no valid tile exists."""
    r_budget = max(1, target_bytes // max(1, c * 128 * itemsize))
    cands = []
    if p <= r_budget:
        cands.append(p)
    r = (min(r_budget, p) // 8) * 8
    while r >= 8:
        if p % r == 0:
            cands.append(r)
        r -= 8
    if not cands:
        return None
    cands = sorted(set(cands), reverse=True)
    for r in cands:
        if n * (p // r) >= _MIN_GRID_STEPS:
            return r
    return cands[0]


# ----------------------------------------------------------------------------
# Wrapper
# ----------------------------------------------------------------------------

def adaptive_feature_extractor(x_nchw, w1, b1, w2, b2, *,
                               target_block_bytes=1 << 20):
    """x_nchw: (N, C, H, W); w1: (C//4, C); b1: (C//4,); w2: (C, C//4); b2: (C,)."""
    N, C, H, W = x_nchw.shape
    Ch = w1.shape[0]
    HW = H * W
    itemsize = jnp.dtype(x_nchw.dtype).itemsize
    sublanes = (8 * 4) // itemsize  # sublanes per vreg for this dtype (f32: 8)

    # Cast the tiny weights/biases once (not per grid step inside the kernel).
    w1f = w1.astype(jnp.float32)
    b1f = b1.astype(jnp.float32)
    w2f = w2.astype(jnp.float32)
    b2f = b2.astype(jnp.float32)

    compiler_params = pltpu.CompilerParams(
        dimension_semantics=("parallel", "parallel"))

    # ---- small-C path: pixels dense on sublanes AND lanes -------------------
    if C < sublanes and HW % 128 == 0:
        P = HW // 128
        R = _pick_tile_rows(P, N, C, itemsize, target_block_bytes)
        if R is not None:
            x4d = x_nchw.reshape(N, C, P, 128)  # free view, no transposes
            out4d = pl.pallas_call(
                _attention_kernel_vpu,
                out_shape=jax.ShapeDtypeStruct((N, C, P, 128), x_nchw.dtype),
                grid_spec=pltpu.PrefetchScalarGridSpec(
                    num_scalar_prefetch=0,
                    grid=(N, P // R),
                    in_specs=[
                        pl.BlockSpec((None, C, R, 128),
                                     lambda n, j: (n, 0, j, 0)),
                        pl.BlockSpec(memory_space=pltpu.MemorySpace.SMEM),  # w1
                        pl.BlockSpec(memory_space=pltpu.MemorySpace.SMEM),  # b1
                        pl.BlockSpec(memory_space=pltpu.MemorySpace.SMEM),  # w2
                        pl.BlockSpec(memory_space=pltpu.MemorySpace.SMEM),  # b2
                    ],
                    out_specs=pl.BlockSpec((None, C, R, 128),
                                           lambda n, j: (n, 0, j, 0)),
                ),
                compiler_params=compiler_params,
            )(x4d, w1f, b1f, w2f, b2f)
            return out4d.reshape(N, C, H, W)

    # ---- generic / large-C path: channels on sublanes, pixels on lanes ------
    hw_padded = pl.cdiv(HW, 128) * 128
    x3d = x_nchw.reshape(N, C, HW)  # free view
    if hw_padded != HW:
        # Keep the output lane-dense for awkward spatial sizes (padding is
        # harmless: 1x1 convs never mix padded pixels with real ones).
        x3d = jnp.pad(x3d, ((0, 0), (0, 0), (0, hw_padded - HW)))
    tile_hw = _pick_tile_lanes(hw_padded, N, C, itemsize, target_block_bytes)

    out3d = pl.pallas_call(
        _attention_kernel_mxu,
        out_shape=jax.ShapeDtypeStruct((N, C, hw_padded), x_nchw.dtype),
        grid_spec=pltpu.PrefetchScalarGridSpec(
            num_scalar_prefetch=0,
            grid=(N, hw_padded // tile_hw),
            in_specs=[
                pl.BlockSpec((None, C, tile_hw), lambda n, j: (n, 0, j)),
                pl.BlockSpec((Ch, C), lambda n, j: (0, 0)),   # w1 (resident)
                pl.BlockSpec((Ch, 1), lambda n, j: (0, 0)),   # b1
                pl.BlockSpec((C, Ch), lambda n, j: (0, 0)),   # w2 (resident)
                pl.BlockSpec((C, 1), lambda n, j: (0, 0)),    # b2
            ],
            out_specs=pl.BlockSpec((None, C, tile_hw), lambda n, j: (n, 0, j)),
        ),
        compiler_params=compiler_params,
    )(x3d, w1f, b1f.reshape(Ch, 1), w2f, b2f.reshape(C, 1))

    if hw_padded != HW:
        out3d = out3d[:, :, :HW]
    return out3d.reshape(N, C, H, W)


# ----------------------------------------------------------------------------
# Reference + demo
# ----------------------------------------------------------------------------

def _reference(x_nchw, w1, b1, w2, b2):
    # Pure-JAX reference of the PyTorch forward (1x1 convs over channels).
    h = jnp.einsum("dc,nchw->ndhw", w1, x_nchw) + b1[None, :, None, None]
    h = jnp.maximum(h, 0.0)
    a = jnp.einsum("cd,ndhw->nchw", w2, h) + b2[None, :, None, None]
    a = jax.nn.sigmoid(a)
    return x_nchw * a


if __name__ == "__main__":
    key = jax.random.PRNGKey(0)
    N, C, H, W = 2, 4, 16, 16
    Ch = C // 4

    k_x, k_w1, k_b1, k_w2, k_b2 = jax.random.split(key, 5)
    x = jax.random.normal(k_x, (N, C, H, W), dtype=jnp.float32)
    # PyTorch Conv2d weights with the 1x1 spatial dims squeezed.
    w1 = 0.1 * jax.random.normal(k_w1, (Ch, C), dtype=jnp.float32)
    b1 = 0.1 * jax.random.normal(k_b1, (Ch,), dtype=jnp.float32)
    w2 = 0.1 * jax.random.normal(k_w2, (C, Ch), dtype=jnp.float32)
    b2 = 0.1 * jax.random.normal(k_b2, (C,), dtype=jnp.float32)

    out = adaptive_feature_extractor(x, w1, b1, w2, b2)
    out = jax.block_until_ready(out)

    ref = _reference(x, w1, b1, w2, b2)
    assert out.shape == (N, C, H, W)
    assert jnp.allclose(out, ref, atol=1e-5, rtol=1e-5), "mismatch vs reference"

    print("KERNEL_OK")
</pallas_src>

<mosaic_0001>
module attributes {stable_mosaic.version = 11 : i64} {
  func.func @_attention_kernel_vpu(%arg0: i32, %arg1: i32, %arg2: memref<1x4x2x128xf32, #tpu.memory_space<vmem>>, %arg3: memref<1x4xf32, #tpu.memory_space<smem>>, %arg4: memref<1xf32, #tpu.memory_space<smem>>, %arg5: memref<4x1xf32, #tpu.memory_space<smem>>, %arg6: memref<4xf32, #tpu.memory_space<smem>>, %arg7: memref<1x4x2x128xf32, #tpu.memory_space<vmem>>) attributes {dimension_semantics = [#tpu.dimension_semantics<parallel>, #tpu.dimension_semantics<parallel>], iteration_bounds = array<i64: 2, 1>, scalar_prefetch = 0 : i64, scratch_operands = 0 : i64, tpu.core_type = #tpu.core_type<tc>, window_params = [{transform_indices = @transform_0, window_bounds = array<i64: 1, 4, 2, 128>}, {transform_indices = @transform_1, window_bounds = array<i64: 1, 4>}, {transform_indices = @transform_2, window_bounds = array<i64: 1>}, {transform_indices = @transform_3, window_bounds = array<i64: 4, 1>}, {transform_indices = @transform_4, window_bounds = array<i64: 4>}, {transform_indices = @transform_5, window_bounds = array<i64: 1, 4, 2, 128>}]} {
    %c0 = arith.constant 0 : index
    %c0_0 = arith.constant 0 : index
    %c0_1 = arith.constant 0 : index
    %c0_2 = arith.constant 0 : index
    %0 = vector.load %arg2[%c0, %c0_0, %c0_1, %c0_2] : memref<1x4x2x128xf32, #tpu.memory_space<vmem>>, vector<1x4x2x128xf32>
    %1 = vector.shape_cast %0 : vector<1x4x2x128xf32> to vector<4x2x128xf32>
    %cst = arith.constant 0.000000e+00 : f32
    %2 = vector.broadcast %cst : f32 to vector<2x128xf32>
    %c0_3 = arith.constant 0 : index
    %3 = memref.load %arg4[%c0_3] : memref<1xf32, #tpu.memory_space<smem>>
    %4 = vector.broadcast %3 : f32 to vector<2x128xf32>
    %5 = arith.addf %2, %4 : vector<2x128xf32>
    %c0_4 = arith.constant 0 : index
    %c0_5 = arith.constant 0 : index
    %6 = memref.load %arg3[%c0_4, %c0_5] : memref<1x4xf32, #tpu.memory_space<smem>>
    %7 = vector.extract_strided_slice %1 {offsets = [0, 0, 0], sizes = [1, 2, 128], strides = [1, 1, 1]} : vector<4x2x128xf32> to vector<1x2x128xf32>
    %8 = vector.shape_cast %7 : vector<1x2x128xf32> to vector<2x128xf32>
    %9 = vector.broadcast %6 : f32 to vector<2x128xf32>
    %10 = arith.mulf %9, %8 : vector<2x128xf32>
    %11 = arith.addf %5, %10 : vector<2x128xf32>
    %c0_6 = arith.constant 0 : index
    %c1 = arith.constant 1 : index
    %12 = memref.load %arg3[%c0_6, %c1] : memref<1x4xf32, #tpu.memory_space<smem>>
    %13 = vector.extract_strided_slice %1 {offsets = [1, 0, 0], sizes = [1, 2, 128], strides = [1, 1, 1]} : vector<4x2x128xf32> to vector<1x2x128xf32>
    %14 = vector.shape_cast %13 : vector<1x2x128xf32> to vector<2x128xf32>
    %15 = vector.broadcast %12 : f32 to vector<2x128xf32>
    %16 = arith.mulf %15, %14 : vector<2x128xf32>
    %17 = arith.addf %11, %16 : vector<2x128xf32>
    %c0_7 = arith.constant 0 : index
    %c2 = arith.constant 2 : index
    %18 = memref.load %arg3[%c0_7, %c2] : memref<1x4xf32, #tpu.memory_space<smem>>
    %19 = vector.extract_strided_slice %1 {offsets = [2, 0, 0], sizes = [1, 2, 128], strides = [1, 1, 1]} : vector<4x2x128xf32> to vector<1x2x128xf32>
    %20 = vector.shape_cast %19 : vector<1x2x128xf32> to vector<2x128xf32>
    %21 = vector.broadcast %18 : f32 to vector<2x128xf32>
    %22 = arith.mulf %21, %20 : vector<2x128xf32>
    %23 = arith.addf %17, %22 : vector<2x128xf32>
    %c0_8 = arith.constant 0 : index
    %c3 = arith.constant 3 : index
    %24 = memref.load %arg3[%c0_8, %c3] : memref<1x4xf32, #tpu.memory_space<smem>>
    %25 = vector.extract_strided_slice %1 {offsets = [3, 0, 0], sizes = [1, 2, 128], strides = [1, 1, 1]} : vector<4x2x128xf32> to vector<1x2x128xf32>
    %26 = vector.shape_cast %25 : vector<1x2x128xf32> to vector<2x128xf32>
    %27 = vector.broadcast %24 : f32 to vector<2x128xf32>
    %28 = arith.mulf %27, %26 : vector<2x128xf32>
    %29 = arith.addf %23, %28 : vector<2x128xf32>
    %cst_9 = arith.constant 0.000000e+00 : f32
    %30 = vector.broadcast %cst_9 : f32 to vector<2x128xf32>
    %31 = arith.maximumf %29, %30 : vector<2x128xf32>
    %cst_10 = arith.constant 0.000000e+00 : f32
    %32 = vector.broadcast %cst_10 : f32 to vector<2x128xf32>
    %c0_11 = arith.constant 0 : index
    %33 = memref.load %arg6[%c0_11] : memref<4xf32, #tpu.memory_space<smem>>
    %34 = vector.broadcast %33 : f32 to vector<2x128xf32>
    %35 = arith.addf %32, %34 : vector<2x128xf32>
    %c0_12 = arith.constant 0 : index
    %c0_13 = arith.constant 0 : index
    %36 = memref.load %arg5[%c0_12, %c0_13] : memref<4x1xf32, #tpu.memory_space<smem>>
    %37 = vector.broadcast %36 : f32 to vector<2x128xf32>
    %38 = arith.mulf %37, %31 : vector<2x128xf32>
    %39 = arith.addf %35, %38 : vector<2x128xf32>
    %40 = arith.negf %39 : vector<2x128xf32>
    %41 = math.exp %40 : vector<2x128xf32>
    %cst_14 = arith.constant 1.000000e+00 : f32
    %42 = vector.broadcast %cst_14 : f32 to vector<2x128xf32>
    %43 = arith.addf %42, %41 : vector<2x128xf32>
    %44 = arith.divf %42, %43 : vector<2x128xf32>
    %45 = vector.extract_strided_slice %1 {offsets = [0, 0, 0], sizes = [1, 2, 128], strides = [1, 1, 1]} : vector<4x2x128xf32> to vector<1x2x128xf32>
    %46 = vector.shape_cast %45 : vector<1x2x128xf32> to vector<2x128xf32>
    %47 = arith.mulf %46, %44 : vector<2x128xf32>
    %c0_15 = arith.constant 0 : index
    %c0_16 = arith.constant 0 : index
    %c0_17 = arith.constant 0 : index
    %c0_18 = arith.constant 0 : index
    %48 = vector.load %arg7[%c0_15, %c0_16, %c0_17, %c0_18] : memref<1x4x2x128xf32, #tpu.memory_space<vmem>>, vector<1x1x2x128xf32>
    %49 = vector.shape_cast %48 : vector<1x1x2x128xf32> to vector<2x128xf32>
    %50 = vector.shape_cast %47 : vector<2x128xf32> to vector<1x1x2x128xf32>
    tpu.vector_store %arg7[%c0_15, %c0_16, %c0_17, %c0_18], %50 {strides = array<i32>} : memref<1x4x2x128xf32, #tpu.memory_space<vmem>>, vector<1x1x2x128xf32>,
    %cst_19 = arith.constant 0.000000e+00 : f32
    %51 = vector.broadcast %cst_19 : f32 to vector<2x128xf32>
    %c1_20 = arith.constant 1 : index
    %52 = memref.load %arg6[%c1_20] : memref<4xf32, #tpu.memory_space<smem>>
    %53 = vector.broadcast %52 : f32 to vector<2x128xf32>
    %54 = arith.addf %51, %53 : vector<2x128xf32>
    %c1_21 = arith.constant 1 : index
    %c0_22 = arith.constant 0 : index
    %55 = memref.load %arg5[%c1_21, %c0_22] : memref<4x1xf32, #tpu.memory_space<smem>>
    %56 = vector.broadcast %55 : f32 to vector<2x128xf32>
    %57 = arith.mulf %56, %31 : vector<2x128xf32>
    %58 = arith.addf %54, %57 : vector<2x128xf32>
    %59 = arith.negf %58 : vector<2x128xf32>
    %60 = math.exp %59 : vector<2x128xf32>
    %cst_23 = arith.constant 1.000000e+00 : f32
    %61 = vector.broadcast %cst_23 : f32 to vector<2x128xf32>
    %62 = arith.addf %61, %60 : vector<2x128xf32>
    %63 = arith.divf %61, %62 : vector<2x128xf32>
    %64 = vector.extract_strided_slice %1 {offsets = [1, 0, 0], sizes = [1, 2, 128], strides = [1, 1, 1]} : vector<4x2x128xf32> to vector<1x2x128xf32>
    %65 = vector.shape_cast %64 : vector<1x2x128xf32> to vector<2x128xf32>
    %66 = arith.mulf %65, %63 : vector<2x128xf32>
    %c0_24 = arith.constant 0 : index
    %c1_25 = arith.constant 1 : index
    %c0_26 = arith.constant 0 : index
    %c0_27 = arith.constant 0 : index
    %67 = vector.load %arg7[%c0_24, %c1_25, %c0_26, %c0_27] : memref<1x4x2x128xf32, #tpu.memory_space<vmem>>, vector<1x1x2x128xf32>
    %68 = vector.shape_cast %67 : vector<1x1x2x128xf32> to vector<2x128xf32>
    %69 = vector.shape_cast %66 : vector<2x128xf32> to vector<1x1x2x128xf32>
    tpu.vector_store %arg7[%c0_24, %c1_25, %c0_26, %c0_27], %69 {strides = array<i32>} : memref<1x4x2x128xf32, #tpu.memory_space<vmem>>, vector<1x1x2x128xf32>,
    %cst_28 = arith.constant 0.000000e+00 : f32
    %70 = vector.broadcast %cst_28 : f32 to vector<2x128xf32>
    %c2_29 = arith.constant 2 : index
    %71 = memref.load %arg6[%c2_29] : memref<4xf32, #tpu.memory_space<smem>>
    %72 = vector.broadcast %71 : f32 to vector<2x128xf32>
    %73 = arith.addf %70, %72 : vector<2x128xf32>
    %c2_30 = arith.constant 2 : index
    %c0_31 = arith.constant 0 : index
    %74 = memref.load %arg5[%c2_30, %c0_31] : memref<4x1xf32, #tpu.memory_space<smem>>
    %75 = vector.broadcast %74 : f32 to vector<2x128xf32>
    %76 = arith.mulf %75, %31 : vector<2x128xf32>
    %77 = arith.addf %73, %76 : vector<2x128xf32>
    %78 = arith.negf %77 : vector<2x128xf32>
    %79 = math.exp %78 : vector<2x128xf32>
    %cst_32 = arith.constant 1.000000e+00 : f32
    %80 = vector.broadcast %cst_32 : f32 to vector<2x128xf32>
    %81 = arith.addf %80, %79 : vector<2x128xf32>
    %82 = arith.divf %80, %81 : vector<2x128xf32>
    %83 = vector.extract_strided_slice %1 {offsets = [2, 0, 0], sizes = [1, 2, 128], strides = [1, 1, 1]} : vector<4x2x128xf32> to vector<1x2x128xf32>
    %84 = vector.shape_cast %83 : vector<1x2x128xf32> to vector<2x128xf32>
    %85 = arith.mulf %84, %82 : vector<2x128xf32>
    %c0_33 = arith.constant 0 : index
    %c2_34 = arith.constant 2 : index
    %c0_35 = arith.constant 0 : index
    %c0_36 = arith.constant 0 : index
    %86 = vector.load %arg7[%c0_33, %c2_34, %c0_35, %c0_36] : memref<1x4x2x128xf32, #tpu.memory_space<vmem>>, vector<1x1x2x128xf32>
    %87 = vector.shape_cast %86 : vector<1x1x2x128xf32> to vector<2x128xf32>
    %88 = vector.shape_cast %85 : vector<2x128xf32> to vector<1x1x2x128xf32>
    tpu.vector_store %arg7[%c0_33, %c2_34, %c0_35, %c0_36], %88 {strides = array<i32>} : memref<1x4x2x128xf32, #tpu.memory_space<vmem>>, vector<1x1x2x128xf32>,
    %cst_37 = arith.constant 0.000000e+00 : f32
    %89 = vector.broadcast %cst_37 : f32 to vector<2x128xf32>
    %c3_38 = arith.constant 3 : index
    %90 = memref.load %arg6[%c3_38] : memref<4xf32, #tpu.memory_space<smem>>
    %91 = vector.broadcast %90 : f32 to vector<2x128xf32>
    %92 = arith.addf %89, %91 : vector<2x128xf32>
    %c3_39 = arith.constant 3 : index
    %c0_40 = arith.constant 0 : index
    %93 = memref.load %arg5[%c3_39, %c0_40] : memref<4x1xf32, #tpu.memory_space<smem>>
    %94 = vector.broadcast %93 : f32 to vector<2x128xf32>
    %95 = arith.mulf %94, %31 : vector<2x128xf32>
    %96 = arith.addf %92, %95 : vector<2x128xf32>
    %97 = arith.negf %96 : vector<2x128xf32>
    %98 = math.exp %97 : vector<2x128xf32>
    %cst_41 = arith.constant 1.000000e+00 : f32
    %99 = vector.broadcast %cst_41 : f32 to vector<2x128xf32>
    %100 = arith.addf %99, %98 : vector<2x128xf32>
    %101 = arith.divf %99, %100 : vector<2x128xf32>
    %102 = vector.extract_strided_slice %1 {offsets = [3, 0, 0], sizes = [1, 2, 128], strides = [1, 1, 1]} : vector<4x2x128xf32> to vector<1x2x128xf32>
    %103 = vector.shape_cast %102 : vector<1x2x128xf32> to vector<2x128xf32>
    %104 = arith.mulf %103, %101 : vector<2x128xf32>
    %c0_42 = arith.constant 0 : index
    %c3_43 = arith.constant 3 : index
    %c0_44 = arith.constant 0 : index
    %c0_45 = arith.constant 0 : index
    %105 = vector.load %arg7[%c0_42, %c3_43, %c0_44, %c0_45] : memref<1x4x2x128xf32, #tpu.memory_space<vmem>>, vector<1x1x2x128xf32>
    %106 = vector.shape_cast %105 : vector<1x1x2x128xf32> to vector<2x128xf32>
    %107 = vector.shape_cast %104 : vector<2x128xf32> to vector<1x1x2x128xf32>
    tpu.vector_store %arg7[%c0_42, %c3_43, %c0_44, %c0_45], %107 {strides = array<i32>} : memref<1x4x2x128xf32, #tpu.memory_space<vmem>>, vector<1x1x2x128xf32>,
    return
  }
  func.func @transform_0(%arg0: i32, %arg1: i32) -> (i32, i32, i32, i32) {
    %c0_i32 = arith.constant 0 : i32
    %c0_i32_0 = arith.constant 0 : i32
    %c0_i32_1 = arith.constant 0 : i32
    return %arg0, %c0_i32, %arg1, %c0_i32_0 : i32, i32, i32, i32
  }
  func.func @transform_1(%arg0: i32, %arg1: i32) -> (i32, i32) {
    %c0_i32 = arith.constant 0 : i32
    %c0_i32_0 = arith.constant 0 : i32
    %c0_i32_1 = arith.constant 0 : i32
    return %c0_i32, %c0_i32_0 : i32, i32
  }
  func.func @transform_2(%arg0: i32, %arg1: i32) -> i32 {
    %c0_i32 = arith.constant 0 : i32
    %c0_i32_0 = arith.constant 0 : i32
    return %c0_i32 : i32
  }
  func.func @transform_3(%arg0: i32, %arg1: i32) -> (i32, i32) {
    %c0_i32 = arith.constant 0 : i32
    %c0_i32_0 = arith.constant 0 : i32
    %c0_i32_1 = arith.constant 0 : i32
    return %c0_i32, %c0_i32_0 : i32, i32
  }
  func.func @transform_4(%arg0: i32, %arg1: i32) -> i32 {
    %c0_i32 = arith.constant 0 : i32
    %c0_i32_0 = arith.constant 0 : i32
    return %c0_i32 : i32
  }
  func.func @transform_5(%arg0: i32, %arg1: i32) -> (i32, i32, i32, i32) {
    %c0_i32 = arith.constant 0 : i32
    %c0_i32_0 = arith.constant 0 : i32
    %c0_i32_1 = arith.constant 0 : i32
    return %arg0, %c0_i32, %arg1, %c0_i32_0 : i32, i32, i32, i32
  }
}

</mosaic_0001>

<bundles_post_ra>
// kernel: tpu_custom_call.1
= control target key start
LH: loop header
LB: loop body
LE: loop exit
PB: predicated region body
PF: predicated region fallthrough
CT: control target
= control target key end

     0   :  { %s1135_s0 = inlined_call_operand.hbm [shape: f32[2,4,2,128], index: 0, kind: input, shape index: {}]   ;;  %s1136_s1 = inlined_call_operand.vmem [shape: f32[1,4], index: 1, kind: input, shape index: {}]   ;;  %s1137_s2 = inlined_call_operand.<no memory space> [shape: f32[1], index: 2, kind: input, shape index: {}]   ;;  %s1138_s3 = inlined_call_operand.vmem [shape: f32[4,1], index: 3, kind: input, shape index: {}]   ;;  %s1139_s4 = inlined_call_operand.vmem [shape: f32[4], index: 4, kind: input, shape index: {}]   ;;  %s1140_s5 = inlined_call_operand.hbm [shape: f32[2,4,2,128], index: 5, kind: output, shape index: {}]  }
   0x1   :  { %10 = sst [smem:[#allocation2]] %s1137_s2 }
   0x2   :  { %11 = vsyncpa [#allocation4], 0 }
   0x3   :  { %13 = vsyncpa [#allocation4 + $0x1], 0 }
   0x4   :  { %14 = vsyncpa [#allocation6], 0 }
   0x5   :  { %15 = vsyncpa [#allocation9], 0 }
   0x6   :  { %16 = vsyncpa [#allocation5], 0 }
   0x7   :  { %18 = vsyncpa [#allocation5 + $0x1], 0  ;;  %s879_s20 = smov 0   ;;  %s881_s21 = smov 0  }
   0x8   :  { %s883_s22 = smov 0   ;;  %s885_s23 = smov 0  }
   0x9   :  { %s887_s24 = smov 0   ;;  %s889_s25 = smov 0  }
   0xa LB: > { %s518_s2 = sadd.s32 4294967295, %s835_s25   ;;  %s519_s26 = sadd.s32 4294967294, %s835_s25   ;;  %s835_s25 = sphi %s889_s25, %s24_s25   ;;  %s831_s24 = sphi %s887_s24, %s1163_s24   ;;  %s827_s23 = sphi %s885_s23, %s1162_s23   ;;  %s823_s22 = sphi %s883_s22, %s1161_s22   ;;  %s819_s21 = sphi %s881_s21, %s1160_s21   ;;  %s815_s20 = sphi %s879_s20, %s1159_s20  }
   0xb   : > { %p58_p0 = scmp.ne.s32.totalorder %s819_s21, %s815_s20  ;;  %p913_p1 = scmp.eq.s32.totalorder %s518_s2, 0 }
   0xc   : > { %p917_p2 = scmp.eq.s32.totalorder %s518_s2, 1  ;;  %p174_p3 = scmp.eq.s32.totalorder %s519_s26, 1 }
   0xd   : > { %s1145_s27 = scalar_select %p913_p1, 1, 0 }
   0xe   : > { %s1146_s28 = scalar_select %p917_p2, 1, 0 }
   0xf   : > { %p923_p4 = por %p913_p1, %p58_p0  ;;  %p520_p5 = scmp.ge.s32.totalorder %s835_s25, 1 }
  0x10   : > { %p928_p6 = por %p174_p3, %p58_p0  ;;  %p181_p7 = scmp.lt.s32.totalorder %s835_s25, 3 }
  0x11   : > { %s1147_s29 = scalar_select %p923_p4, 1, 0 }
  0x12   : > { %s1148_s30 = scalar_select %p928_p6, 1, 0 }
  0x13   : > { %s208_s8 = sshll.u32 %s1138_s3, 4  ;;  %p936_p8 = pnand %p520_p5, %p181_p7  ;;  %s209_s8 = int_to_ptr.vmem [resolvable:$true] %s208_s8 }
  0x14   : > { %s194_s12 = sshll.u32 %s1136_s1, 4  ;;  %s219_s16 = sshll.u32 %s1139_s4, 4  ;;  %s195_s12 = int_to_ptr.vmem [resolvable:$true] %s194_s12  ;;  %s955_s16 = int_to_ptr.vmem [resolvable:$true] %s219_s16 }
  0x15   : > { %s1149_s9 = scalar_select %p936_p8, 1, 0 }
  0x16   : > { %p573_p10 = pneg %p936_p8  ;;  %s670_s17 = scalar_lea.vmem %s209_s8, 64 }
  0x17   : > { %p671_p12 = scmp.ne.s32.totalorder %s209_s8, %s670_s17  ;;  %p678_p5 = scmp.lt.s32.totalorder %s209_s8, %s209_s8 }
  0x18   : > { %p948_p11 = pnand %p573_p10, %p913_p1  ;;  %p679_p7 = scmp.lt.s32.totalorder %s670_s17, %s670_s17 }
  0x1a   : > { %p672_p13 = pneg %p948_p11  ;;  %p680_p10 = por %p679_p7, %p678_p5 }
  0x1c   : > { %p673_p0 = pnand %p672_p13, %p671_p12 }
  0x1e   : > { %p674_p3 = pneg %p673_p0 }
  0x20   : > { %p681_p9 = pnand %p680_p10, %p674_p3 }
  0x22   : > { %684 = shalt.err (!%p681_p9)
}
  0x23   : > { %s837_s18 = smov [#allocation8]   ;;  %s685_s19 = scalar_lea.vmem %s195_s12, 16 }
  0x24   : > { %579 = dma.vmem_to_smem (!%p948_p11), %s209_s8, 64, %s837_s18, [#allocation9]  }
  0x25   : > { %p686_p6 = scmp.ne.s32.totalorder %s195_s12, %s685_s19  ;;  %p693_p8 = scmp.lt.s32.totalorder %s195_s12, %s195_s12 }
  0x26   : > { %p694_p2 = scmp.lt.s32.totalorder %s685_s19, %s685_s19 }
  0x27   : > { %p688_p1 = pnand %p686_p6, %p672_p13 }
  0x28   : > { %p695_p12 = por %p694_p2, %p693_p8 }
  0x29   : > { %p689_p4 = pneg %p688_p1 }
  0x2b   : > { %p696_p0 = pnand %p695_p12, %p689_p4 }
  0x2d   : > { %699 = shalt.err (!%p696_p0)
}
  0x2e   : > { %s838_s2 = smov [#allocation7]   ;;  %s700_s26 = scalar_lea.vmem %s955_s16, 16 }
  0x2f   : > { %576 = dma.vmem_to_smem (!%p948_p11), %s195_s12, 16, %s838_s2, [#allocation6]  }
  0x30   : > { %p701_p9 = scmp.ne.s32.totalorder %s955_s16, %s700_s26  ;;  %p708_p1 = scmp.lt.s32.totalorder %s955_s16, %s955_s16 }
  0x31   : > { %p709_p5 = scmp.lt.s32.totalorder %s700_s26, %s700_s26 }
  0x32   : > { %p703_p3 = pnand %p701_p9, %p672_p13 }
  0x33   : > { %p710_p2 = por %p709_p5, %p708_p1 }
  0x34   : > { %p704_p6 = pneg %p703_p3 }
  0x36   : > { %p711_p4 = pnand %p710_p2, %p704_p6 }
  0x38   : > { %714 = shalt.err (!%p711_p4)
}
  0x39   : > { %s839_s6 = smov [#allocation10]   ;;  %s45_s7 = sadd.s32 1, %s823_s22 }
  0x3a   : > { %582 = dma.vmem_to_smem (!%p948_p11), %s955_s16, 16, %s839_s6, [#allocation9]  }
  0x3b   : > { %s36_s8 = sadd.s32 1, %s831_s24  ;;  %p52_p8 = scmp.ne.s32.totalorder %s823_s22, %s819_s21 }
  0x3c   : > { %p38_p13 = scmp.ge.s32.totalorder %s36_s8, 2  ;;  %p53_p7 = scmp.eq.s32.totalorder %s835_s25, 0 }
  0x3d   : > { %p1151_p10 = scmp.ne.s32.totalorder %s1146_s28, 0  ;;  %p594_p0 = scmp.lt.s32.totalorder %s835_s25, 2 }
  0x3e   : > { %s1165_s8 = smov (%p38_p13, %s36_s8), 0  ;;  %p54_p9 = por %p53_p7, %p52_p8 }
  0x3f   : > { %p986_p12 = por %p1151_p10, %p52_p8  ;;  %s230_s11 = sand.u32 1, %s823_s22  }
  0x40   : > { %s40_s12 = ssub.s32 %s831_s24, %s1165_s8  ;;  %s525_s13 = sshll.u32 %s230_s11, 3 }
  0x41   : > { %p43_p3 = scmp.eq.s32.totalorder %s40_s12, 0  ;;  %s555_s14 = sshll.u32 %s831_s24, 7 }
  0x42   : > { %s1003_s28 = scalar_lea.hbm %s1135_s0, %s555_s14  ;;  %s234_s18 = scalar_lea.vmem [#allocation3], %s525_s13 }
  0x43   : > { %s998_s15 = scalar_select %p43_p3, %s823_s22, %s45_s7  }
  0x44   : > { %s242_s19 = sshll.u32 %s234_s18, 4  ;;  %p1009_p11 = pnand %p594_p0, %p54_p9  ;;  %s1005_s19 = int_to_ptr.vmem [resolvable:$true] %s242_s19 }
  0x45   : > { %s1013_s26 = scalar_lea.sflag [#allocation4], %s230_s11  ;;  %s715_s6 = scalar_lea.hbm %s1003_s28, 128 }
  0x46   : > { %p716_p6 = scmp.ne.s32.totalorder %s1003_s28, %s715_s6  ;;  %p717_p1 = pneg %p1009_p11 }
  0x47   : > { %s720_s13 = scalar_lea.hbm %s1135_s0, 256  ;;  %p721_p4 = scmp.lt.u32.totalorder %s1003_s28, %s1135_s0 }
  0x48   : > { %p718_p5 = pnand %p717_p1, %p716_p6  ;;  %p722_p8 = scmp.lt.u32.totalorder %s720_s13, %s715_s6 }
  0x49   : > { %p724_p7 = scmp.lt.u32.totalorder %s715_s6, %s1003_s28 }
  0x4a   : > { %p719_p2 = pneg %p718_p5  ;;  %p723_p13 = por %p722_p8, %p721_p4 }
  0x4c   : > { %p725_p10 = por %p724_p7, %p723_p13 }
  0x4e   : > { %p726_p0 = pnand %p725_p10, %p719_p2 }
  0x50   : > { %729 = shalt.err (!%p726_p0)
}
  0x51   : > { %s730_s11 = scalar_lea.vmem %s1005_s19, 128  ;;  %s840_s17 = smov [#allocation3]  }
  0x52   : > { %p731_p9 = scmp.ne.s32.totalorder %s1005_s19, %s730_s11  ;;  %s735_s18 = sshll.u32 %s840_s17, 4  ;;  %s736_s18 = int_to_ptr.vmem [resolvable:$false] %s735_s18 }
  0x53   : > { %s737_s7 = scalar_lea.vmem %s736_s18, 256  ;;  %p738_p5 = scmp.lt.s32.totalorder %s1005_s19, %s736_s18 }
  0x54   : > { %p733_p3 = pnand %p731_p9, %p717_p1  ;;  %p739_p4 = scmp.lt.s32.totalorder %s737_s7, %s730_s11 }
  0x56   : > { %p734_p6 = pneg %p733_p3  ;;  %p740_p8 = por %p739_p4, %p738_p5 }
  0x58   : > { %p741_p13 = pnand %p740_p8, %p734_p6 }
  0x5a   : > { %744 = shalt.err (!%p741_p13)
}
  0x5b   : > { %s841_s6 = smov 32   ;;  %s842_s12 = smov 2  }
  0x5c   : > { %586 = dma.hbm_to_vmem [thread:$0]  (!%p1009_p11), %s1003_s28, 128, %s1005_s19, %s1013_s26, %s841_s6, %s841_s6, %s842_s12  }
  0x5d   : > { %p1154_p1 = scmp.ne.s32.totalorder %s1149_s9, 0 }
  0x5e   : > { %s1044_s13 = sand.u32 (!%p1154_p1), 1, %s819_s21   ;;  %p1155_p2 = scmp.ne.s32.totalorder (!%p1154_p1), %s1147_s29, 0 }
  0x5f   : > { %254 = sbr.rel (%p1154_p1) target bundleno = 180 (0xb4), region = 40  ;;  %s529_s14 = sshll.u32 (!%p1154_p1), %s1044_s13, 3 }
  0x60   : > { %s257_s16 = scalar_lea.sflag (!%p1154_p1), [#allocation4], %s1044_s13  ;;  %s260_s11 = scalar_lea.vmem (!%p1154_p1), [#allocation3], %s529_s14 }
  0x66   : > { %798 = dma.done.wait (%p1155_p2), %s257_s16, 128  }
  0x67   : > { %800 = vsyncadd (%p1155_p2), %s257_s16, 4294967168  ;;  %p1156_p11 = scmp.ne.s32.totalorder %s1145_s27, 0 }
  0x69   : > { %802 = dma.done.wait (%p1156_p11), [#allocation6], 16  }
  0x6a   : > { %804 = vsyncadd (%p1156_p11), [#allocation6], 4294967280 }
  0x6b   : > { %806 = dma.done.wait (%p1156_p11), [#allocation9], 80  }
  0x6c   : > { %808 = vsyncadd (%p1156_p11), [#allocation9], 4294967216 }
  0x6d   : > { %277 = sfence }
  0x6e   : > { %s304_s9 = sld [smem:[#allocation2]]  ;;  %s534_s19 = sld [smem:[#allocation7 + $0x1]]  ;;  %v1062_v0 = vld [vmem:[%s260_s11] sm:$0x3]  ;;  %v1064_v1 = vld [vmem:[%s260_s11 + $0x2] sm:$0x3] }
  0x6f   : > { %s307_s28 = sld [smem:[#allocation7]]  ;;  %s535_s2 = sld [smem:[#allocation7 + $0x2]]  ;;  %v1066_v2 = vld [vmem:[%s260_s11 + $0x4] sm:$0x3]  ;;  %v1070_v9 = vld [vmem:[%s260_s11 + $0x6] sm:$0x3] }
  0x70   : > { %s536_s26 = sld [smem:[#allocation7 + $0x3]]  ;;  %s327_s27 = sld [smem:[#allocation8]] }
  0x71   : > { %s539_s29 = sld [smem:[#allocation8 + $0x80]]  ;;  %s538_s6 = sld [smem:[#allocation10 + $0x1]] }
  0x72   : > { %s543_s17 = sld [smem:[#allocation8 + $0x100]]  ;;  %s542_s12 = sld [smem:[#allocation10 + $0x2]] }
  0x73   : > { %s547_s18 = sld [smem:[#allocation8 + $0x180]]  ;;  %s546_s16 = sld [smem:[#allocation10 + $0x3]] }
  0x74   : > { %v305_v3 = vstv %s304_s9  ;;  %v312_v5 = vstv %s534_s19  ;;  %s324_s7 = sld [smem:[#allocation10]]  ;;  %s299_s11 = scalar_lea.vmem [#allocation11], %s529_s14 }
  0x75   : > { %v308_v4 = vstv %s307_s28  ;;  %v313_v7 = vmul.f32 %v312_v5, %v1064_v1  ;;  %v316_v8 = vstv %s535_s2  ;;  %s402_s9 = sshll.u32 %s299_s11, 4  ;;  %s556_s28 = sshll.u32 %s827_s23, 7  ;;  %s1079_s9 = int_to_ptr.vmem [resolvable:$true] %s402_s9 }
  0x76   : > { %v309_v6 = vmul.f32 %v308_v4, %v1062_v0  ;;  %v320_v10 = vstv %s536_s26  ;;  %v317_v12 = vmul.f32 %v316_v8, %v1066_v2  ;;  %v328_v17 = vstv %s327_s27  ;;  %s1086_s2 = scalar_lea.hbm %s1140_s5, %s556_s28  ;;  %s388_s23 = scalar_lea.sflag [#allocation5], %s1044_s13 }
  0x77   : > { %v321_v14 = vmul.f32 %v320_v10, %v1070_v9  ;;  %v343_v18 = vstv %s539_s29  ;;  %v340_v23 = vstv %s538_s6  ;;  %s745_s26 = scalar_lea.vmem %s1079_s9, 128  ;;  %s843_s27 = smov [#allocation11]  }
  0x78   : > { %v310_v11 = vadd.f32 %v309_v6, %v305_v3  ;;  %v359_v19 = vstv %s543_s17  ;;  %v356_v24 = vstv %s542_s12  ;;  %p746_p7 = scmp.ne.s32.totalorder %s1079_s9, %s745_s26  ;;  %s749_s29 = sshll.u32 %s843_s27, 4  ;;  %s750_s29 = int_to_ptr.vmem [resolvable:$false] %s749_s29 }
  0x79   : > { %v375_v20 = vstv %s547_s18  ;;  %v372_v25 = vstv %s546_s16  ;;  %s751_s17 = scalar_lea.vmem %s750_s29, 256  ;;  %p752_p9 = scmp.lt.s32.totalorder %s1079_s9, %s750_s29 }
  0x7a   : > { %v314_v13 = vadd.f32 %v313_v7, %v310_v11  ;;  %v325_v22 = vstv %s324_s7  ;;  %p747_p10 = pnand %p746_p7, %p986_p12  ;;  %p753_p3 = scmp.lt.s32.totalorder %s751_s17, %s745_s26 }
  0x7c   : > { %v318_v15 = vadd.f32 %v317_v12, %v314_v13  ;;  %p748_p0 = pneg %p747_p10  ;;  %p754_p6 = por %p753_p3, %p752_p9 }
  0x7e   : > { %v322_v16 = vadd.f32 %v321_v14, %v318_v15  ;;  %p755_p5 = pnand %p754_p6, %p748_p0 }
  0x80   : > { %v323_v21 = vmax.f32 %v322_v16, 0.0 }
  0x82   : > { %v329_v26 = vmul.f32 %v328_v17, %v323_v21  ;;  %v344_v27 = vmul.f32 %v343_v18, %v323_v21  ;;  %v360_v28 = vmul.f32 %v359_v19, %v323_v21  ;;  %v376_v29 = vmul.f32 %v375_v20, %v323_v21 }
  0x84   : > { %v330_v30 = vadd.f32 %v329_v26, %v325_v22  ;;  %v345_v31 = vadd.f32 %v344_v27, %v340_v23  ;;  %v361_v32 = vadd.f32 %v360_v28, %v356_v24  ;;  %v377_v33 = vadd.f32 %v376_v29, %v372_v25 }
  0x86   : > { %v537_v34 = vmul.f32 -1.442695, %v330_v30  ;;  %v540_v35 = vmul.f32 -1.442695, %v345_v31  ;;  %v544_v36 = vmul.f32 -1.442695, %v361_v32 }
  0x87   : > { %v548_v37 = vmul.f32 -1.442695, %v377_v33 }
  0x88   : > { %654 = vpow2.f32 %v537_v34 }
  0x89   : > { %656 = vpow2.f32 %v540_v35 }
  0x8a   : > { %658 = vpow2.f32 %v544_v36 }
  0x8b   : > { %660 = vpow2.f32 %v548_v37 }
  0x92   : > { %v655_v38 = vpop.eup %654 }
  0x93   : > { %v657_v39 = vpop.eup %656  ;;  %v334_v40 = vadd.f32 1.0, %v655_v38 }
  0x94   : > { %v659_v41 = vpop.eup %658  ;;  %v349_v42 = vadd.f32 1.0, %v657_v39 }
  0x95   : > { %v661_v43 = vpop.eup %660  ;;  %662 = vrcp.f32 %v334_v40  ;;  %v365_v44 = vadd.f32 1.0, %v659_v41 }
  0x96   : > { %664 = vrcp.f32 %v349_v42  ;;  %v381_v45 = vadd.f32 1.0, %v661_v43 }
  0x97   : > { %666 = vrcp.f32 %v365_v44 }
  0x98   : > { %668 = vrcp.f32 %v381_v45 }
  0x9f   : > { %v663_v46 = vpop.eup %662 }
  0xa0   : > { %v665_v47 = vpop.eup %664  ;;  %v337_v48 = vmul.f32 %v663_v46, %v1062_v0 }
  0xa1   : > { %v667_v49 = vpop.eup %666  ;;  %v352_v50 = vmul.f32 %v665_v47, %v1064_v1 }
  0xa2   : > { %v669_v51 = vpop.eup %668  ;;  %338 = vst [vmem:[%s299_s11] sm:$0x3] %v337_v48  ;;  %v368_v52 = vmul.f32 %v667_v49, %v1066_v2 }
  0xa3   : > { %541 = vst [vmem:[%s299_s11 + $0x2] sm:$0x3] %v352_v50  ;;  %v384_v53 = vmul.f32 %v669_v51, %v1070_v9 }
  0xa4   : > { %545 = vst [vmem:[%s299_s11 + $0x4] sm:$0x3] %v368_v52 }
  0xa5   : > { %549 = vst [vmem:[%s299_s11 + $0x6] sm:$0x3] %v384_v53 }
  0xa6   : > { %758 = shalt.err (!%p755_p5)
}
  0xa7   : > { %s759_s18 = scalar_lea.hbm %s1086_s2, 128  ;;  %s763_s12 = scalar_lea.hbm %s1140_s5, 256 }
  0xa8   : > { %p760_p4 = scmp.ne.s32.totalorder %s1086_s2, %s759_s18  ;;  %p764_p1 = scmp.lt.u32.totalorder %s1086_s2, %s1140_s5 }
  0xa9   : > { %p765_p2 = scmp.lt.u32.totalorder %s763_s12, %s759_s18  ;;  %p767_p7 = scmp.lt.u32.totalorder %s759_s18, %s1086_s2 }
  0xaa   : > { %p761_p8 = pnand %p760_p4, %p986_p12 }
  0xab   : > { %p766_p11 = por %p765_p2, %p764_p1 }
  0xac   : > { %p762_p13 = pneg %p761_p8 }
  0xad   : > { %p768_p10 = por %p767_p7, %p766_p11 }
  0xaf   : > { %p769_p0 = pnand %p768_p10, %p762_p13 }
  0xb1   : > { %772 = shalt.err (!%p769_p0)
}
  0xb2   : > { %s844_s28 = smov 32   ;;  %s845_s14 = smov 2  }
  0xb3   : > { %571 = dma.vmem_to_hbm [thread:$0]  (%p986_p12), %s1079_s9, 128, %s1086_s2, %s388_s23, %s844_s28, %s844_s28, %s845_s14  }
  0xb4 PF: > { %s417_s19 = sand.u32 1, %s815_s20   ;;  %p1157_p9 = scmp.ne.s32.totalorder %s1148_s30, 0 }
  0xb5   : > { %p1158_p3 = scmp.ge.s32.totalorder %s835_s25, 2  ;;  %s418_s26 = scalar_lea.sflag [#allocation5], %s417_s19 }
  0xb7   : > { %p588_p6 = pnand %p1158_p3, %p1157_p9 }
  0xb9   : > { %810 = dma.done.wait (!%p588_p6), %s418_s26, 128  }
  0xba   : > { %812 = vsyncadd (!%p588_p6), %s418_s26, 4294967168  ;;  %s24_s25 = sadd.s32 1, %s835_s25   ;;  %s1159_s20 = smov %s819_s21 }
  0xbb   : > { %p21_p5 = scmp.ge.s32.totalorder %s24_s25, 4   ;;  %s1160_s21 = smov %s823_s22 }
  0xbc   : > { %s1161_s22 = smov %s998_s15  ;;  %s1162_s23 = smov %s831_s24 }
  0xbd   : > { %s1163_s24 = smov %s1165_s8  ;;  %23 = sbr.rel (!%p21_p5) target bundleno = 10 (0xa), region = 101 }
  0xc4   :  { %423 = vsyncpa [#allocation4], 1 }
  0xc5   :  { %425 = vsyncpa [#allocation4 + $0x1], 1 }
  0xc6   :  { %426 = vsyncpa [#allocation5], 1 }
  0xc7   :  { %428 = vsyncpa [#allocation5 + $0x1], 1 }
  0xc8   :  { %429 = vsyncpa [#allocation6], 1 }
  0xc9   :  { %431 = vsyncpa [#allocation6 + $0x1], 1 }
  0xca   :  { %432 = vsyncpa [#allocation9], 1 }

</bundles_post_ra>
